<compile_context>
chip_gen: v6e
topology: v6e:2x2x1
jax: 0.10.0
libtpu: 0.0.40
codegen_flags: <defaults>
</compile_context>

<pallas_src>
import functools

import jax
import jax.numpy as jnp
from jax.experimental import pallas as pl
from jax.experimental.pallas import tpu as pltpu

KH = KW = 3  # conv kernel size


def _round_up(v, m):
    return ((v + m - 1) // m) * m


def conv3x3_x3_kernel(x_ref, w_ref, o_ref, *, W, P):
    """Single grid step over the whole batch.

    x_ref: (N, Cin, Hpad)      flattened + zero-padded image, H*W on lanes
    w_ref: (KH*KW, Cout, Cin)  per-tap weights, pre-scaled by 3 (x1+x2+x3 folded)
    o_ref: (N, Cout, P)        lane-dense output slab (P multiple of 128)
    """
    N = x_ref.shape[0]
    Cout = o_ref.shape[1]
    for n in range(N):                              # N=2 -> fully unrolled
        x = x_ref[n]                                # (Cin, Hpad), one VMEM load
        acc = jnp.zeros((Cout, P), jnp.float32)
        for kh in range(KH):
            for kw in range(KW):
                s = kh * W + kw                     # static lane shift of this tap
                tap = x[:, s:s + P]                 # (Cin, P) shifted window
                acc = acc + jnp.dot(w_ref[kh * KW + kw], tap,
                                    preferred_element_type=jnp.float32)
        o_ref[n] = acc.astype(o_ref.dtype)          # unmasked, lane-dense store


def make_conv_weights(w_oihw):
    """OIHW -> (KH*KW, Cout, Cin), with the x1+x2+x3 (=3x) folded in.

    Weights are static per model, so this tiny re-layout is done once, outside
    the jitted forward.
    """
    Cout, Cin = w_oihw.shape[0], w_oihw.shape[1]
    return 3.0 * jnp.transpose(w_oihw, (2, 3, 0, 1)).reshape(KH * KW, Cout, Cin)


def example_model_forward(x_nchw, w_taps):
    """Equivalent of ExampleModel.forward. Input NCHW, output NCHW (valid conv)."""
    N, Cin, H, W = x_nchw.shape
    Cout = w_taps.shape[1]
    Ho, Wo = H - KH + 1, W - KW + 1

    # Lane-dense output span and input padding so every tap slice is in bounds.
    P = _round_up((Ho - 1) * W + Wo, 128)           # 222 -> 256
    shift_max = (KH - 1) * W + (KW - 1)             # 34
    Hpad = _round_up(P + shift_max, 128)            # 290 -> 384

    x_flat = x_nchw.reshape(N, Cin, H * W)          # free reshape, no transpose
    x_flat = jnp.pad(x_flat, ((0, 0), (0, 0), (0, Hpad - H * W)))

    flops = 2 * N * Cout * Cin * KH * KW * P
    bytes_accessed = 4 * (N * Cin * Hpad + w_taps.size + N * Cout * P)

    y = pl.pallas_call(
        functools.partial(conv3x3_x3_kernel, W=W, P=P),
        out_shape=jax.ShapeDtypeStruct((N, Cout, P), x_nchw.dtype),
        grid_spec=pltpu.PrefetchScalarGridSpec(
            num_scalar_prefetch=0,
            grid=(1,),                               # whole batch in one step
            in_specs=[
                pl.BlockSpec((N, Cin, Hpad), lambda i: (0, 0, 0)),
                pl.BlockSpec((KH * KW, Cout, Cin), lambda i: (0, 0, 0)),
            ],
            out_specs=pl.BlockSpec((N, Cout, P), lambda i: (0, 0, 0)),
        ),
        compiler_params=pltpu.CompilerParams(
            dimension_semantics=("arbitrary",)),
        cost_estimate=pl.CostEstimate(
            flops=flops, transcendentals=0, bytes_accessed=bytes_accessed),
    )(x_flat, w_taps)

    # Valid outputs live at flattened positions p = h*W + w (h < Ho, w < Wo).
    # For this model P=256 is a multiple of W=16 and covers all Ho rows, so
    # this is a free reshape plus one small slice (generic fallback pads first).
    rows_cover = Ho * W
    if P < rows_cover or P % W:
        y = jnp.pad(y, ((0, 0), (0, 0),
                        (0, _round_up(max(P, rows_cover), W) - P)))
    y = y.reshape(N, Cout, -1, W)[:, :, :Ho, :Wo]
    return y


if __name__ == "__main__":
    # NOTE: conv1/conv2/conv3, linear and self.weight in __init__ are unused in
    # forward(), so only the shared 3x3 conv's weights are materialized.
    key = jax.random.PRNGKey(0)
    k_x, k_w = jax.random.split(key)

    N, C, H, W = 2, 16, 16, 16                 # forward() requires Cin = 16
    x = jax.random.normal(k_x, (N, C, H, W), dtype=jnp.float32)
    # Conv weight in PyTorch OIHW layout (Cout, Cin, 3, 3).
    w = jax.random.normal(k_w, (16, 16, KH, KW), dtype=jnp.float32) * 0.1

    w_taps = make_conv_weights(w)              # static-weight prep, outside jit
    fwd = jax.jit(example_model_forward)
    out = jax.block_until_ready(fwd(x, w_taps))

    # Sanity check against XLA's reference convolution (x3 for the triple add).
    ref = 3.0 * jax.lax.conv_general_dilated(
        x, w, window_strides=(1, 1), padding="VALID",
        dimension_numbers=("NCHW", "OIHW", "NCHW"))
    assert out.shape == (N, 16, H - 2, W - 2), out.shape
    assert jnp.allclose(out, ref, atol=1e-4, rtol=1e-4), "mismatch vs reference conv"

    print("KERNEL_OK")
</pallas_src>

<mosaic_0001>
module attributes {stable_mosaic.version = 11 : i64} {
  func.func @conv3x3_x3_kernel(%arg0: i32, %arg1: memref<2x16x384xf32, #tpu.memory_space<vmem>>, %arg2: memref<9x16x16xf32, #tpu.memory_space<vmem>>, %arg3: memref<2x16x256xf32, #tpu.memory_space<vmem>>) attributes {dimension_semantics = [#tpu.dimension_semantics<arbitrary>], iteration_bounds = array<i64: 1>, scalar_prefetch = 0 : i64, scratch_operands = 0 : i64, tpu.core_type = #tpu.core_type<tc>, window_params = [{pipeline_mode = #tpu.pipeline_mode<synchronous>, transform_indices = @transform_0, window_bounds = array<i64: 2, 16, 384>}, {pipeline_mode = #tpu.pipeline_mode<synchronous>, transform_indices = @transform_1, window_bounds = array<i64: 9, 16, 16>}, {pipeline_mode = #tpu.pipeline_mode<synchronous>, transform_indices = @transform_2, window_bounds = array<i64: 2, 16, 256>}]} {
    %c0 = arith.constant 0 : index
    %c0_0 = arith.constant 0 : index
    %c0_1 = arith.constant 0 : index
    %0 = vector.load %arg1[%c0, %c0_0, %c0_1] : memref<2x16x384xf32, #tpu.memory_space<vmem>>, vector<1x16x384xf32>
    %1 = vector.shape_cast %0 : vector<1x16x384xf32> to vector<16x384xf32>
    %cst = arith.constant 0.000000e+00 : f32
    %2 = vector.broadcast %cst : f32 to vector<16x256xf32>
    %3 = vector.extract_strided_slice %1 {offsets = [0, 0], sizes = [16, 256], strides = [1, 1]} : vector<16x384xf32> to vector<16x256xf32>
    %c0_2 = arith.constant 0 : index
    %c0_3 = arith.constant 0 : index
    %c0_4 = arith.constant 0 : index
    %4 = vector.load %arg2[%c0_2, %c0_3, %c0_4] : memref<9x16x16xf32, #tpu.memory_space<vmem>>, vector<1x16x16xf32>
    %5 = vector.shape_cast %4 : vector<1x16x16xf32> to vector<16x16xf32>
    %cst_5 = arith.constant dense<0.000000e+00> : vector<16x256xf32>
    %6 = tpu.matmul %5, %3, %cst_5 {dimension_numbers = #tpu.dot_dimension_numbers<[1], [0], [0], [1], [0, 0, 1, 1], [], []>} : vector<16x16xf32>, vector<16x256xf32>, vector<16x256xf32> -> vector<16x256xf32>
    %7 = arith.addf %2, %6 : vector<16x256xf32>
    %8 = vector.extract_strided_slice %1 {offsets = [0, 1], sizes = [16, 256], strides = [1, 1]} : vector<16x384xf32> to vector<16x256xf32>
    %c1 = arith.constant 1 : index
    %c0_6 = arith.constant 0 : index
    %c0_7 = arith.constant 0 : index
    %9 = vector.load %arg2[%c1, %c0_6, %c0_7] : memref<9x16x16xf32, #tpu.memory_space<vmem>>, vector<1x16x16xf32>
    %10 = vector.shape_cast %9 : vector<1x16x16xf32> to vector<16x16xf32>
    %cst_8 = arith.constant dense<0.000000e+00> : vector<16x256xf32>
    %11 = tpu.matmul %10, %8, %cst_8 {dimension_numbers = #tpu.dot_dimension_numbers<[1], [0], [0], [1], [0, 0, 1, 1], [], []>} : vector<16x16xf32>, vector<16x256xf32>, vector<16x256xf32> -> vector<16x256xf32>
    %12 = arith.addf %7, %11 : vector<16x256xf32>
    %13 = vector.extract_strided_slice %1 {offsets = [0, 2], sizes = [16, 256], strides = [1, 1]} : vector<16x384xf32> to vector<16x256xf32>
    %c2 = arith.constant 2 : index
    %c0_9 = arith.constant 0 : index
    %c0_10 = arith.constant 0 : index
    %14 = vector.load %arg2[%c2, %c0_9, %c0_10] : memref<9x16x16xf32, #tpu.memory_space<vmem>>, vector<1x16x16xf32>
    %15 = vector.shape_cast %14 : vector<1x16x16xf32> to vector<16x16xf32>
    %cst_11 = arith.constant dense<0.000000e+00> : vector<16x256xf32>
    %16 = tpu.matmul %15, %13, %cst_11 {dimension_numbers = #tpu.dot_dimension_numbers<[1], [0], [0], [1], [0, 0, 1, 1], [], []>} : vector<16x16xf32>, vector<16x256xf32>, vector<16x256xf32> -> vector<16x256xf32>
    %17 = arith.addf %12, %16 : vector<16x256xf32>
    %18 = vector.extract_strided_slice %1 {offsets = [0, 16], sizes = [16, 256], strides = [1, 1]} : vector<16x384xf32> to vector<16x256xf32>
    %c3 = arith.constant 3 : index
    %c0_12 = arith.constant 0 : index
    %c0_13 = arith.constant 0 : index
    %19 = vector.load %arg2[%c3, %c0_12, %c0_13] : memref<9x16x16xf32, #tpu.memory_space<vmem>>, vector<1x16x16xf32>
    %20 = vector.shape_cast %19 : vector<1x16x16xf32> to vector<16x16xf32>
    %cst_14 = arith.constant dense<0.000000e+00> : vector<16x256xf32>
    %21 = tpu.matmul %20, %18, %cst_14 {dimension_numbers = #tpu.dot_dimension_numbers<[1], [0], [0], [1], [0, 0, 1, 1], [], []>} : vector<16x16xf32>, vector<16x256xf32>, vector<16x256xf32> -> vector<16x256xf32>
    %22 = arith.addf %17, %21 : vector<16x256xf32>
    %23 = vector.extract_strided_slice %1 {offsets = [0, 17], sizes = [16, 256], strides = [1, 1]} : vector<16x384xf32> to vector<16x256xf32>
    %c4 = arith.constant 4 : index
    %c0_15 = arith.constant 0 : index
    %c0_16 = arith.constant 0 : index
    %24 = vector.load %arg2[%c4, %c0_15, %c0_16] : memref<9x16x16xf32, #tpu.memory_space<vmem>>, vector<1x16x16xf32>
    %25 = vector.shape_cast %24 : vector<1x16x16xf32> to vector<16x16xf32>
    %cst_17 = arith.constant dense<0.000000e+00> : vector<16x256xf32>
    %26 = tpu.matmul %25, %23, %cst_17 {dimension_numbers = #tpu.dot_dimension_numbers<[1], [0], [0], [1], [0, 0, 1, 1], [], []>} : vector<16x16xf32>, vector<16x256xf32>, vector<16x256xf32> -> vector<16x256xf32>
    %27 = arith.addf %22, %26 : vector<16x256xf32>
    %28 = vector.extract_strided_slice %1 {offsets = [0, 18], sizes = [16, 256], strides = [1, 1]} : vector<16x384xf32> to vector<16x256xf32>
    %c5 = arith.constant 5 : index
    %c0_18 = arith.constant 0 : index
    %c0_19 = arith.constant 0 : index
    %29 = vector.load %arg2[%c5, %c0_18, %c0_19] : memref<9x16x16xf32, #tpu.memory_space<vmem>>, vector<1x16x16xf32>
    %30 = vector.shape_cast %29 : vector<1x16x16xf32> to vector<16x16xf32>
    %cst_20 = arith.constant dense<0.000000e+00> : vector<16x256xf32>
    %31 = tpu.matmul %30, %28, %cst_20 {dimension_numbers = #tpu.dot_dimension_numbers<[1], [0], [0], [1], [0, 0, 1, 1], [], []>} : vector<16x16xf32>, vector<16x256xf32>, vector<16x256xf32> -> vector<16x256xf32>
    %32 = arith.addf %27, %31 : vector<16x256xf32>
    %33 = vector.extract_strided_slice %1 {offsets = [0, 32], sizes = [16, 256], strides = [1, 1]} : vector<16x384xf32> to vector<16x256xf32>
    %c6 = arith.constant 6 : index
    %c0_21 = arith.constant 0 : index
    %c0_22 = arith.constant 0 : index
    %34 = vector.load %arg2[%c6, %c0_21, %c0_22] : memref<9x16x16xf32, #tpu.memory_space<vmem>>, vector<1x16x16xf32>
    %35 = vector.shape_cast %34 : vector<1x16x16xf32> to vector<16x16xf32>
    %cst_23 = arith.constant dense<0.000000e+00> : vector<16x256xf32>
    %36 = tpu.matmul %35, %33, %cst_23 {dimension_numbers = #tpu.dot_dimension_numbers<[1], [0], [0], [1], [0, 0, 1, 1], [], []>} : vector<16x16xf32>, vector<16x256xf32>, vector<16x256xf32> -> vector<16x256xf32>
    %37 = arith.addf %32, %36 : vector<16x256xf32>
    %38 = vector.extract_strided_slice %1 {offsets = [0, 33], sizes = [16, 256], strides = [1, 1]} : vector<16x384xf32> to vector<16x256xf32>
    %c7 = arith.constant 7 : index
    %c0_24 = arith.constant 0 : index
    %c0_25 = arith.constant 0 : index
    %39 = vector.load %arg2[%c7, %c0_24, %c0_25] : memref<9x16x16xf32, #tpu.memory_space<vmem>>, vector<1x16x16xf32>
    %40 = vector.shape_cast %39 : vector<1x16x16xf32> to vector<16x16xf32>
    %cst_26 = arith.constant dense<0.000000e+00> : vector<16x256xf32>
    %41 = tpu.matmul %40, %38, %cst_26 {dimension_numbers = #tpu.dot_dimension_numbers<[1], [0], [0], [1], [0, 0, 1, 1], [], []>} : vector<16x16xf32>, vector<16x256xf32>, vector<16x256xf32> -> vector<16x256xf32>
    %42 = arith.addf %37, %41 : vector<16x256xf32>
    %43 = vector.extract_strided_slice %1 {offsets = [0, 34], sizes = [16, 256], strides = [1, 1]} : vector<16x384xf32> to vector<16x256xf32>
    %c8 = arith.constant 8 : index
    %c0_27 = arith.constant 0 : index
    %c0_28 = arith.constant 0 : index
    %44 = vector.load %arg2[%c8, %c0_27, %c0_28] : memref<9x16x16xf32, #tpu.memory_space<vmem>>, vector<1x16x16xf32>
    %45 = vector.shape_cast %44 : vector<1x16x16xf32> to vector<16x16xf32>
    %cst_29 = arith.constant dense<0.000000e+00> : vector<16x256xf32>
    %46 = tpu.matmul %45, %43, %cst_29 {dimension_numbers = #tpu.dot_dimension_numbers<[1], [0], [0], [1], [0, 0, 1, 1], [], []>} : vector<16x16xf32>, vector<16x256xf32>, vector<16x256xf32> -> vector<16x256xf32>
    %47 = arith.addf %42, %46 : vector<16x256xf32>
    %c0_30 = arith.constant 0 : index
    %c0_31 = arith.constant 0 : index
    %c0_32 = arith.constant 0 : index
    %48 = vector.load %arg3[%c0_30, %c0_31, %c0_32] : memref<2x16x256xf32, #tpu.memory_space<vmem>>, vector<1x16x256xf32>
    %49 = vector.shape_cast %48 : vector<1x16x256xf32> to vector<16x256xf32>
    %50 = vector.shape_cast %47 : vector<16x256xf32> to vector<1x16x256xf32>
    tpu.vector_store %arg3[%c0_30, %c0_31, %c0_32], %50 {strides = array<i32>} : memref<2x16x256xf32, #tpu.memory_space<vmem>>, vector<1x16x256xf32>,
    %c1_33 = arith.constant 1 : index
    %c0_34 = arith.constant 0 : index
    %c0_35 = arith.constant 0 : index
    %51 = vector.load %arg1[%c1_33, %c0_34, %c0_35] : memref<2x16x384xf32, #tpu.memory_space<vmem>>, vector<1x16x384xf32>
    %52 = vector.shape_cast %51 : vector<1x16x384xf32> to vector<16x384xf32>
    %cst_36 = arith.constant 0.000000e+00 : f32
    %53 = vector.broadcast %cst_36 : f32 to vector<16x256xf32>
    %54 = vector.extract_strided_slice %52 {offsets = [0, 0], sizes = [16, 256], strides = [1, 1]} : vector<16x384xf32> to vector<16x256xf32>
    %c0_37 = arith.constant 0 : index
    %c0_38 = arith.constant 0 : index
    %c0_39 = arith.constant 0 : index
    %55 = vector.load %arg2[%c0_37, %c0_38, %c0_39] : memref<9x16x16xf32, #tpu.memory_space<vmem>>, vector<1x16x16xf32>
    %56 = vector.shape_cast %55 : vector<1x16x16xf32> to vector<16x16xf32>
    %cst_40 = arith.constant dense<0.000000e+00> : vector<16x256xf32>
    %57 = tpu.matmul %56, %54, %cst_40 {dimension_numbers = #tpu.dot_dimension_numbers<[1], [0], [0], [1], [0, 0, 1, 1], [], []>} : vector<16x16xf32>, vector<16x256xf32>, vector<16x256xf32> -> vector<16x256xf32>
    %58 = arith.addf %53, %57 : vector<16x256xf32>
    %59 = vector.extract_strided_slice %52 {offsets = [0, 1], sizes = [16, 256], strides = [1, 1]} : vector<16x384xf32> to vector<16x256xf32>
    %c1_41 = arith.constant 1 : index
    %c0_42 = arith.constant 0 : index
    %c0_43 = arith.constant 0 : index
    %60 = vector.load %arg2[%c1_41, %c0_42, %c0_43] : memref<9x16x16xf32, #tpu.memory_space<vmem>>, vector<1x16x16xf32>
    %61 = vector.shape_cast %60 : vector<1x16x16xf32> to vector<16x16xf32>
    %cst_44 = arith.constant dense<0.000000e+00> : vector<16x256xf32>
    %62 = tpu.matmul %61, %59, %cst_44 {dimension_numbers = #tpu.dot_dimension_numbers<[1], [0], [0], [1], [0, 0, 1, 1], [], []>} : vector<16x16xf32>, vector<16x256xf32>, vector<16x256xf32> -> vector<16x256xf32>
    %63 = arith.addf %58, %62 : vector<16x256xf32>
    %64 = vector.extract_strided_slice %52 {offsets = [0, 2], sizes = [16, 256], strides = [1, 1]} : vector<16x384xf32> to vector<16x256xf32>
    %c2_45 = arith.constant 2 : index
    %c0_46 = arith.constant 0 : index
    %c0_47 = arith.constant 0 : index
    %65 = vector.load %arg2[%c2_45, %c0_46, %c0_47] : memref<9x16x16xf32, #tpu.memory_space<vmem>>, vector<1x16x16xf32>
    %66 = vector.shape_cast %65 : vector<1x16x16xf32> to vector<16x16xf32>
    %cst_48 = arith.constant dense<0.000000e+00> : vector<16x256xf32>
    %67 = tpu.matmul %66, %64, %cst_48 {dimension_numbers = #tpu.dot_dimension_numbers<[1], [0], [0], [1], [0, 0, 1, 1], [], []>} : vector<16x16xf32>, vector<16x256xf32>, vector<16x256xf32> -> vector<16x256xf32>
    %68 = arith.addf %63, %67 : vector<16x256xf32>
    %69 = vector.extract_strided_slice %52 {offsets = [0, 16], sizes = [16, 256], strides = [1, 1]} : vector<16x384xf32> to vector<16x256xf32>
    %c3_49 = arith.constant 3 : index
    %c0_50 = arith.constant 0 : index
    %c0_51 = arith.constant 0 : index
    %70 = vector.load %arg2[%c3_49, %c0_50, %c0_51] : memref<9x16x16xf32, #tpu.memory_space<vmem>>, vector<1x16x16xf32>
    %71 = vector.shape_cast %70 : vector<1x16x16xf32> to vector<16x16xf32>
    %cst_52 = arith.constant dense<0.000000e+00> : vector<16x256xf32>
    %72 = tpu.matmul %71, %69, %cst_52 {dimension_numbers = #tpu.dot_dimension_numbers<[1], [0], [0], [1], [0, 0, 1, 1], [], []>} : vector<16x16xf32>, vector<16x256xf32>, vector<16x256xf32> -> vector<16x256xf32>
    %73 = arith.addf %68, %72 : vector<16x256xf32>
    %74 = vector.extract_strided_slice %52 {offsets = [0, 17], sizes = [16, 256], strides = [1, 1]} : vector<16x384xf32> to vector<16x256xf32>
    %c4_53 = arith.constant 4 : index
    %c0_54 = arith.constant 0 : index
    %c0_55 = arith.constant 0 : index
    %75 = vector.load %arg2[%c4_53, %c0_54, %c0_55] : memref<9x16x16xf32, #tpu.memory_space<vmem>>, vector<1x16x16xf32>
    %76 = vector.shape_cast %75 : vector<1x16x16xf32> to vector<16x16xf32>
    %cst_56 = arith.constant dense<0.000000e+00> : vector<16x256xf32>
    %77 = tpu.matmul %76, %74, %cst_56 {dimension_numbers = #tpu.dot_dimension_numbers<[1], [0], [0], [1], [0, 0, 1, 1], [], []>} : vector<16x16xf32>, vector<16x256xf32>, vector<16x256xf32> -> vector<16x256xf32>
    %78 = arith.addf %73, %77 : vector<16x256xf32>
    %79 = vector.extract_strided_slice %52 {offsets = [0, 18], sizes = [16, 256], strides = [1, 1]} : vector<16x384xf32> to vector<16x256xf32>
    %c5_57 = arith.constant 5 : index
    %c0_58 = arith.constant 0 : index
    %c0_59 = arith.constant 0 : index
    %80 = vector.load %arg2[%c5_57, %c0_58, %c0_59] : memref<9x16x16xf32, #tpu.memory_space<vmem>>, vector<1x16x16xf32>
    %81 = vector.shape_cast %80 : vector<1x16x16xf32> to vector<16x16xf32>
    %cst_60 = arith.constant dense<0.000000e+00> : vector<16x256xf32>
    %82 = tpu.matmul %81, %79, %cst_60 {dimension_numbers = #tpu.dot_dimension_numbers<[1], [0], [0], [1], [0, 0, 1, 1], [], []>} : vector<16x16xf32>, vector<16x256xf32>, vector<16x256xf32> -> vector<16x256xf32>
    %83 = arith.addf %78, %82 : vector<16x256xf32>
    %84 = vector.extract_strided_slice %52 {offsets = [0, 32], sizes = [16, 256], strides = [1, 1]} : vector<16x384xf32> to vector<16x256xf32>
    %c6_61 = arith.constant 6 : index
    %c0_62 = arith.constant 0 : index
    %c0_63 = arith.constant 0 : index
    %85 = vector.load %arg2[%c6_61, %c0_62, %c0_63] : memref<9x16x16xf32, #tpu.memory_space<vmem>>, vector<1x16x16xf32>
    %86 = vector.shape_cast %85 : vector<1x16x16xf32> to vector<16x16xf32>
    %cst_64 = arith.constant dense<0.000000e+00> : vector<16x256xf32>
    %87 = tpu.matmul %86, %84, %cst_64 {dimension_numbers = #tpu.dot_dimension_numbers<[1], [0], [0], [1], [0, 0, 1, 1], [], []>} : vector<16x16xf32>, vector<16x256xf32>, vector<16x256xf32> -> vector<16x256xf32>
    %88 = arith.addf %83, %87 : vector<16x256xf32>
    %89 = vector.extract_strided_slice %52 {offsets = [0, 33], sizes = [16, 256], strides = [1, 1]} : vector<16x384xf32> to vector<16x256xf32>
    %c7_65 = arith.constant 7 : index
    %c0_66 = arith.constant 0 : index
    %c0_67 = arith.constant 0 : index
    %90 = vector.load %arg2[%c7_65, %c0_66, %c0_67] : memref<9x16x16xf32, #tpu.memory_space<vmem>>, vector<1x16x16xf32>
    %91 = vector.shape_cast %90 : vector<1x16x16xf32> to vector<16x16xf32>
    %cst_68 = arith.constant dense<0.000000e+00> : vector<16x256xf32>
    %92 = tpu.matmul %91, %89, %cst_68 {dimension_numbers = #tpu.dot_dimension_numbers<[1], [0], [0], [1], [0, 0, 1, 1], [], []>} : vector<16x16xf32>, vector<16x256xf32>, vector<16x256xf32> -> vector<16x256xf32>
    %93 = arith.addf %88, %92 : vector<16x256xf32>
    %94 = vector.extract_strided_slice %52 {offsets = [0, 34], sizes = [16, 256], strides = [1, 1]} : vector<16x384xf32> to vector<16x256xf32>
    %c8_69 = arith.constant 8 : index
    %c0_70 = arith.constant 0 : index
    %c0_71 = arith.constant 0 : index
    %95 = vector.load %arg2[%c8_69, %c0_70, %c0_71] : memref<9x16x16xf32, #tpu.memory_space<vmem>>, vector<1x16x16xf32>
    %96 = vector.shape_cast %95 : vector<1x16x16xf32> to vector<16x16xf32>
    %cst_72 = arith.constant dense<0.000000e+00> : vector<16x256xf32>
    %97 = tpu.matmul %96, %94, %cst_72 {dimension_numbers = #tpu.dot_dimension_numbers<[1], [0], [0], [1], [0, 0, 1, 1], [], []>} : vector<16x16xf32>, vector<16x256xf32>, vector<16x256xf32> -> vector<16x256xf32>
    %98 = arith.addf %93, %97 : vector<16x256xf32>
    %c1_73 = arith.constant 1 : index
    %c0_74 = arith.constant 0 : index
    %c0_75 = arith.constant 0 : index
    %99 = vector.load %arg3[%c1_73, %c0_74, %c0_75] : memref<2x16x256xf32, #tpu.memory_space<vmem>>, vector<1x16x256xf32>
    %100 = vector.shape_cast %99 : vector<1x16x256xf32> to vector<16x256xf32>
    %101 = vector.shape_cast %98 : vector<16x256xf32> to vector<1x16x256xf32>
    tpu.vector_store %arg3[%c1_73, %c0_74, %c0_75], %101 {strides = array<i32>} : memref<2x16x256xf32, #tpu.memory_space<vmem>>, vector<1x16x256xf32>,
    return
  }
  func.func @transform_0(%arg0: i32) -> (i32, i32, i32) {
    %c0_i32 = arith.constant 0 : i32
    %c0_i32_0 = arith.constant 0 : i32
    %c0_i32_1 = arith.constant 0 : i32
    %c0_i32_2 = arith.constant 0 : i32
    return %c0_i32, %c0_i32_0, %c0_i32_1 : i32, i32, i32
  }
  func.func @transform_1(%arg0: i32) -> (i32, i32, i32) {
    %c0_i32 = arith.constant 0 : i32
    %c0_i32_0 = arith.constant 0 : i32
    %c0_i32_1 = arith.constant 0 : i32
    %c0_i32_2 = arith.constant 0 : i32
    return %c0_i32, %c0_i32_0, %c0_i32_1 : i32, i32, i32
  }
  func.func @transform_2(%arg0: i32) -> (i32, i32, i32) {
    %c0_i32 = arith.constant 0 : i32
    %c0_i32_0 = arith.constant 0 : i32
    %c0_i32_1 = arith.constant 0 : i32
    %c0_i32_2 = arith.constant 0 : i32
    return %c0_i32, %c0_i32_0, %c0_i32_1 : i32, i32, i32
  }
}

</mosaic_0001>

<bundles_post_ra>
// kernel: example_model_forward.1
= control target key start
LH: loop header
LB: loop body
LE: loop exit
PB: predicated region body
PF: predicated region fallthrough
CT: control target
= control target key end

     0   :  { %s2059_s13 = smov 127   ;;  %v2060_v6 = vmov 0.0   ;;  %s2061_s22 = smov 126   ;;  %vm49_vm0 = vcmask 130048   ;;  %vm40_vm1 = vcmask 1039360   ;;  %vm231_vm2 = vcmask 1031168   ;;  %s2619_s0 = inlined_call_operand.vmem [shape: f32[2,16,384], index: 0, kind: input, shape index: {}]   ;;  %s2620_s1 = inlined_call_operand.vmem [shape: f32[9,16,16], index: 1, kind: input, shape index: {}]   ;;  %s2621_s2 = inlined_call_operand.vmem [shape: f32[2,16,256], index: 2, kind: output, shape index: {}]  }
   0x1   :  { %v2086_v0 = vld [vmem:[%s2619_s0 + $0x20] sm:$0xff]  ;;  %v2091_v1 = vld [vmem:[%s2619_s0 + $0x18] sm:$0xff]  ;;  %v2100_v2 = vld [vmem:[%s2619_s0 + $0x28] sm:$0xff]  ;;  %120 = vmatprep.mubr.f32.mxu0 %v2060_v6  ;;  %203 = vmatprep.mubr.f32.mxu1 %v2060_v6  ;;  %s2062_s25 = smov 112   ;;  %s2063_s26 = smov 111   ;;  %vm342_vm3 = vcmask 916480  }
   0x2   :  { %36 = vrot.lane.b32.xlu0 %v2086_v0, %s2059_s13  ;;  %34 = vrot.lane.b32.xlu1 %v2091_v1, %s2059_s13  ;;  %v2105_v3 = vld [vmem:[%s2619_s0 + $0x8] sm:$0xff]  ;;  %v2117_v4 = vld [vmem:[%s2619_s0] sm:$0xff]  ;;  %s2064_s29 = smov 110   ;;  %s2065_s30 = smov 96   ;;  %vm453_vm4 = vcmask 908288   ;;  %vm564_vm5 = vcmask 900096  }
   0x3   :  { %167 = vmatprep.subr.mxu1 %v2086_v0  ;;  %v13_v5 = vld [vmem:[%s2619_s0 + $0x10] sm:$0xff]  ;;  %v2139_v7 = vld [vmem:[%s2620_s1] sm:$0xff]  ;;  %v2165_v8 = vld [vmem:[%s2620_s1 + $0x8] sm:$0xff]  ;;  %s2066_s3 = smov 95   ;;  %s2067_s4 = smov 94   ;;  %vm675_vm6 = vcmask 785408  }
   0x4   :  { %168 = vmatpush1.msra.mxu1 %v2091_v1  ;;  %v2221_v9 = vld [vmem:[%s2619_s0 + $0x50] sm:$0xff]  ;;  %v2229_v10 = vld [vmem:[%s2619_s0 + $0x58] sm:$0xff]  ;;  %v2238_v11 = vld [vmem:[%s2619_s0 + $0x48] sm:$0xff]  ;;  %vm786_vm7 = vcmask 777216   ;;  %vm897_vm8 = vcmask 769024  }
   0x5   :  { %169 = vmatprep.subr.mxu1 %v2105_v3  ;;  %v2243_v12 = vld [vmem:[%s2619_s0 + $0x38] sm:$0xff]  ;;  %v2252_v13 = vld [vmem:[%s2619_s0 + $0x40] sm:$0xff]  ;;  %v2257_v14 = vld [vmem:[%s2619_s0 + $0x30] sm:$0xff] }
   0x6   :  { %38 = vrot.lane.b32.xlu0 %v2100_v2, %s2059_s13  ;;  %30 = vrot.lane.b32.xlu1 %v2105_v3, %s2059_s13  ;;  %v2286_v25 = vld [vmem:[%s2620_s1 + $0x10] sm:$0xff]  ;;  %v2299_v29 = vld [vmem:[%s2620_s1 + $0x18] sm:$0xff] }
   0x7   :  { %170 = vmatpush1.msra.mxu1 %v2117_v4  ;;  %v2323_v40 = vld [vmem:[%s2620_s1 + $0x20] sm:$0xff]  ;;  %v2336_v44 = vld [vmem:[%s2620_s1 + $0x28] sm:$0xff]  ;;  %v2349_v49 = vld [vmem:[%s2620_s1 + $0x30] sm:$0xff] }
   0x8   :  { %1976 = vmatmul.mubr.msk.f32.vlgmr.msra.gmra.mxu1 %vm49_vm0, %v2139_v7  ;;  %v2363_v53 = vld [vmem:[%s2620_s1 + $0x38] sm:$0xff] }
   0x9   :  { %209 = vmatprep.mubr.f32.mxu1 %v2060_v6 }
   0xa   :  { %32 = vrot.lane.b32.xlu0 %v13_v5, %s2059_s13  ;;  %28 = vrot.lane.b32.xlu1 %v2117_v4, %s2059_s13 }
   0xc   :  { %1977 = vmatmul.mubr.msk.f32.gmra.mxu1 %vm49_vm0, %v2165_v8 }
   0xd   :  { %421 = vmatprep.mubr.f32.mxu1 %v2060_v6 }
   0xe   :  { %227 = vrot.lane.b32.xlu0 %v2086_v0, %s2061_s22  ;;  %229 = vrot.lane.b32.xlu1 %v2100_v2, %s2061_s22 }
  0x12   :  { %225 = vrot.lane.b32.xlu0 %v2091_v1, %s2061_s22  ;;  %221 = vrot.lane.b32.xlu1 %v2105_v3, %s2061_s22 }
  0x16   :  { %223 = vrot.lane.b32.xlu0 %v13_v5, %s2061_s22  ;;  %338 = vrot.lane.b32.xlu1 %v2086_v0, %s2062_s25 }
  0x1a   :  { %340 = vrot.lane.b32.xlu0 %v2100_v2, %s2062_s25  ;;  %219 = vrot.lane.b32.xlu1 %v2117_v4, %s2061_s22 }
  0x1e   :  { %336 = vrot.lane.b32.xlu0 %v2091_v1, %s2062_s25  ;;  %332 = vrot.lane.b32.xlu1 %v2105_v3, %s2062_s25 }
  0x22   :  { %334 = vrot.lane.b32.xlu0 %v13_v5, %s2062_s25  ;;  %330 = vrot.lane.b32.xlu1 %v2117_v4, %s2062_s25 }
  0x26   :  { %449 = vrot.lane.b32.xlu0 %v2086_v0, %s2063_s26  ;;  %451 = vrot.lane.b32.xlu1 %v2100_v2, %s2063_s26 }
  0x2a   :  { %447 = vrot.lane.b32.xlu0 %v2091_v1, %s2063_s26  ;;  %443 = vrot.lane.b32.xlu1 %v2105_v3, %s2063_s26 }
  0x2e   :  { %445 = vrot.lane.b32.xlu0 %v13_v5, %s2063_s26  ;;  %560 = vrot.lane.b32.xlu1 %v2086_v0, %s2064_s29 }
  0x32   :  { %562 = vrot.lane.b32.xlu0 %v2100_v2, %s2064_s29  ;;  %441 = vrot.lane.b32.xlu1 %v2117_v4, %s2063_s26 }
  0x36   :  { %558 = vrot.lane.b32.xlu0 %v2091_v1, %s2064_s29  ;;  %554 = vrot.lane.b32.xlu1 %v2105_v3, %s2064_s29 }
  0x3a   :  { %556 = vrot.lane.b32.xlu0 %v13_v5, %s2064_s29  ;;  %552 = vrot.lane.b32.xlu1 %v2117_v4, %s2064_s29 }
  0x3e   :  { %671 = vrot.lane.b32.xlu0 %v2086_v0, %s2065_s30  ;;  %673 = vrot.lane.b32.xlu1 %v2100_v2, %s2065_s30 }
  0x42   :  { %669 = vrot.lane.b32.xlu0 %v2091_v1, %s2065_s30  ;;  %665 = vrot.lane.b32.xlu1 %v2105_v3, %s2065_s30 }
  0x46   :  { %667 = vrot.lane.b32.xlu0 %v13_v5, %s2065_s30  ;;  %782 = vrot.lane.b32.xlu1 %v2086_v0, %s2066_s3 }
  0x4a   :  { %784 = vrot.lane.b32.xlu0 %v2100_v2, %s2066_s3  ;;  %663 = vrot.lane.b32.xlu1 %v2117_v4, %s2065_s30 }
  0x4e   :  { %780 = vrot.lane.b32.xlu0 %v2091_v1, %s2066_s3  ;;  %776 = vrot.lane.b32.xlu1 %v2105_v3, %s2066_s3 }
  0x52   :  { %778 = vrot.lane.b32.xlu0 %v13_v5, %s2066_s3  ;;  %774 = vrot.lane.b32.xlu1 %v2117_v4, %s2066_s3 }
  0x56   :  { %893 = vrot.lane.b32.xlu0 %v2086_v0, %s2067_s4  ;;  %895 = vrot.lane.b32.xlu1 %v2100_v2, %s2067_s4  ;;  %v2387_v0 = vld [vmem:[%s2620_s1 + $0x40] sm:$0xff] }
  0x5a   :  { %891 = vrot.lane.b32.xlu0 %v2091_v1, %s2067_s4  ;;  %887 = vrot.lane.b32.xlu1 %v2105_v3, %s2067_s4 }
  0x5e   :  { %889 = vrot.lane.b32.xlu0 %v13_v5, %s2067_s4  ;;  %1022 = vrot.lane.b32.xlu1 %v2221_v9, %s2059_s13 }
  0x62   :  { %1024 = vrot.lane.b32.xlu0 %v2229_v10, %s2059_s13  ;;  %885 = vrot.lane.b32.xlu1 %v2117_v4, %s2067_s4  ;;  %v2400_v4 = vld [vmem:[%s2620_s1 + $0x48] sm:$0xff] }
  0x66   :  { %1020 = vrot.lane.b32.xlu0 %v2238_v11, %s2059_s13  ;;  %1016 = vrot.lane.b32.xlu1 %v2243_v12, %s2059_s13 }
  0x6a   :  { %1018 = vrot.lane.b32.xlu0 %v2252_v13, %s2059_s13  ;;  %1014 = vrot.lane.b32.xlu1 %v2257_v14, %s2059_s13 }
  0x6e   :  { %1210 = vrot.lane.b32.xlu0 %v2221_v9, %s2061_s22  ;;  %1212 = vrot.lane.b32.xlu1 %v2229_v10, %s2061_s22 }
  0x72   :  { %1208 = vrot.lane.b32.xlu0 %v2238_v11, %s2061_s22  ;;  %1204 = vrot.lane.b32.xlu1 %v2243_v12, %s2061_s22 }
  0x74   :  { %v37_v15 = vpop.permute.xlu0 %36  ;;  %v35_v16 = vpop.permute.xlu1 %34 }
  0x75   :  { %v43_v20 = vsel %vm40_vm1, %v35_v16, %v37_v15 }
  0x76   :  { %1206 = vrot.lane.b32.xlu0 %v2252_v13, %s2061_s22  ;;  %1202 = vrot.lane.b32.xlu1 %v2257_v14, %s2061_s22 }
  0x78   :  { %v39_v17 = vpop.permute.xlu0 %38  ;;  %v31_v18 = vpop.permute.xlu1 %30 }
  0x79   :  { %v44_v19 = vsel %vm40_vm1, %v37_v15, %v39_v17 }
  0x7a   :  { %84 = vmatprep.subr.mxu0 %v44_v19  ;;  %1319 = vrot.lane.b32.xlu0 %v2221_v9, %s2062_s25 }
  0x7b   :  { %1321 = vrot.lane.b32.xlu1 %v2229_v10, %s2062_s25  ;;  %85 = vmatpush1.msra.mxu0 %v43_v20 }
  0x7c   :  { %v33_v21 = vpop.permute.xlu0 %32  ;;  %v29_v22 = vpop.permute.xlu1 %28 }
  0x7d   :  { %v42_v23 = vsel %vm40_vm1, %v31_v18, %v33_v21  ;;  %v41_v24 = vsel %vm40_vm1, %v29_v22, %v31_v18  ;;  %v2413_v18 = vld [vmem:[%s2620_s1 + $0x50] sm:$0xff]  ;;  %v2427_v22 = vld [vmem:[%s2620_s1 + $0x58] sm:$0xff] }
  0x7e   :  { %1317 = vrot.lane.b32.xlu0 %v2238_v11, %s2062_s25  ;;  %86 = vmatprep.subr.mxu0 %v42_v23 }
  0x7f   :  { %1313 = vrot.lane.b32.xlu1 %v2243_v12, %s2062_s25  ;;  %87 = vmatpush1.msra.mxu0 %v41_v24 }
  0x80   :  { %v228_v26 = vpop.permute.xlu0 %227  ;;  %v230_v27 = vpop.permute.xlu1 %229  ;;  %1974 = vmatmul.mubr.msk.f32.vlgmr.msra.gmra.mxu0 %vm49_vm0, %v2286_v25 }
  0x81   :  { %v235_v28 = vsel %vm231_vm2, %v228_v26, %v230_v27  ;;  %126 = vmatprep.mubr.f32.mxu0 %v2060_v6 }
  0x82   :  { %1315 = vrot.lane.b32.xlu0 %v2252_v13, %s2062_s25  ;;  %274 = vmatprep.subr.mxu0 %v235_v28 }
  0x83   :  { %1428 = vrot.lane.b32.xlu1 %v2221_v9, %s2063_s26 }
  0x84   :  { %v226_v30 = vpop.permute.xlu0 %225  ;;  %v222_v31 = vpop.permute.xlu1 %221  ;;  %1975 = vmatmul.mubr.msk.f32.gmra.mxu0 %vm49_vm0, %v2299_v29 }
  0x85   :  { %v234_v32 = vsel %vm231_vm2, %v226_v30, %v228_v26  ;;  %310 = vmatprep.mubr.f32.mxu0 %v2060_v6 }
  0x86   :  { %1430 = vrot.lane.b32.xlu0 %v2229_v10, %s2063_s26  ;;  %275 = vmatpush1.msra.mxu0 %v234_v32 }
  0x87   :  { %1311 = vrot.lane.b32.xlu1 %v2257_v14, %s2062_s25 }
  0x88   :  { %v224_v33 = vpop.permute.xlu0 %223  ;;  %v339_v34 = vpop.permute.xlu1 %338 }
  0x89   :  { %v233_v35 = vsel %vm231_vm2, %v222_v31, %v224_v33 }
  0x8a   :  { %1426 = vrot.lane.b32.xlu0 %v2238_v11, %s2063_s26  ;;  %276 = vmatprep.subr.mxu0 %v233_v35 }
  0x8b   :  { %1422 = vrot.lane.b32.xlu1 %v2243_v12, %s2063_s26 }
  0x8c   :  { %v341_v36 = vpop.permute.xlu0 %340  ;;  %v220_v37 = vpop.permute.xlu1 %219 }
  0x8d   :  { %v232_v38 = vsel %vm231_vm2, %v220_v37, %v222_v31  ;;  %v346_v39 = vsel %vm342_vm3, %v339_v34, %v341_v36 }
  0x8e   :  { %1424 = vrot.lane.b32.xlu0 %v2252_v13, %s2063_s26  ;;  %277 = vmatpush1.msra.mxu0 %v232_v38  ;;  %v2464_v38 = vld [vmem:[%s2620_s1 + $0x68] sm:$0xff] }
  0x8f   :  { %1420 = vrot.lane.b32.xlu1 %v2257_v14, %s2063_s26  ;;  %385 = vmatprep.subr.mxu1 %v346_v39 }
  0x90   :  { %v337_v41 = vpop.permute.xlu0 %336  ;;  %v333_v42 = vpop.permute.xlu1 %332  ;;  %1980 = vmatmul.mubr.msk.f32.vlgmr.msra.gmra.mxu0 %vm49_vm0, %v2323_v40 }
  0x91   :  { %v345_v43 = vsel %vm342_vm3, %v337_v41, %v339_v34  ;;  %316 = vmatprep.mubr.f32.mxu0 %v2060_v6  ;;  %v2451_v34 = vld [vmem:[%s2620_s1 + $0x60] sm:$0xff] }
  0x92   :  { %1537 = vrot.lane.b32.xlu0 %v2221_v9, %s2064_s29  ;;  %386 = vmatpush1.msra.mxu1 %v345_v43  ;;  %v2473_v43 = vld [vmem:[%s2620_s1 + $0x70] sm:$0xff] }
  0x93   :  { %1539 = vrot.lane.b32.xlu1 %v2229_v10, %s2064_s29 }
  0x94   :  { %v335_v45 = vpop.permute.xlu0 %334  ;;  %v331_v46 = vpop.permute.xlu1 %330  ;;  %1981 = vmatmul.mubr.msk.f32.gmra.mxu0 %vm49_vm0, %v2336_v44 }
  0x95   :  { %v343_v47 = vsel %vm342_vm3, %v331_v46, %v333_v42  ;;  %v344_v48 = vsel %vm342_vm3, %v333_v42, %v335_v45  ;;  %532 = vmatprep.mubr.f32.mxu0 %v2060_v6 }
  0x96   :  { %1535 = vrot.lane.b32.xlu0 %v2238_v11, %s2064_s29  ;;  %387 = vmatprep.subr.mxu1 %v344_v48  ;;  %v2483_v48 = vld [vmem:[%s2620_s1 + $0x78] sm:$0xff] }
  0x97   :  { %1531 = vrot.lane.b32.xlu1 %v2243_v12, %s2064_s29  ;;  %388 = vmatpush1.msra.mxu1 %v343_v47 }
  0x98   :  { %v450_v50 = vpop.permute.xlu0 %449  ;;  %v452_v51 = vpop.permute.xlu1 %451  ;;  %1984 = vmatmul.mubr.msk.f32.vlgmr.msra.gmra.mxu1 %vm49_vm0, %v2349_v49 }
  0x99   :  { %v457_v52 = vsel %vm453_vm4, %v450_v50, %v452_v51  ;;  %427 = vmatprep.mubr.f32.mxu1 %v2060_v6 }
  0x9a   :  { %1533 = vrot.lane.b32.xlu0 %v2252_v13, %s2064_s29  ;;  %496 = vmatprep.subr.mxu0 %v457_v52 }
  0x9b   :  { %1646 = vrot.lane.b32.xlu1 %v2221_v9, %s2065_s30 }
  0x9c   :  { %v448_v54 = vpop.permute.xlu0 %447  ;;  %v444_v55 = vpop.permute.xlu1 %443  ;;  %1985 = vmatmul.mubr.msk.f32.gmra.mxu1 %vm49_vm0, %v2363_v53 }
  0x9d   :  { %v456_v56 = vsel %vm453_vm4, %v448_v54, %v450_v50  ;;  %643 = vmatprep.mubr.f32.mxu1 %v2060_v6 }
  0x9e   :  { %1648 = vrot.lane.b32.xlu0 %v2229_v10, %s2065_s30  ;;  %497 = vmatpush1.msra.mxu0 %v456_v56 }
  0x9f   :  { %1529 = vrot.lane.b32.xlu1 %v2257_v14, %s2064_s29 }
  0xa0   :  { %v446_v57 = vpop.permute.xlu0 %445  ;;  %v561_v58 = vpop.permute.xlu1 %560 }
  0xa1   :  { %v455_v59 = vsel %vm453_vm4, %v444_v55, %v446_v57 }
  0xa2   :  { %1644 = vrot.lane.b32.xlu0 %v2238_v11, %s2065_s30  ;;  %498 = vmatprep.subr.mxu0 %v455_v59  ;;  %v2493_v59 = vld [vmem:[%s2620_s1 + $0x80] sm:$0xff] }
  0xa3   :  { %1640 = vrot.lane.b32.xlu1 %v2243_v12, %s2065_s30 }
  0xa4   :  { %v563_v60 = vpop.permute.xlu0 %562  ;;  %v442_v61 = vpop.permute.xlu1 %441 }
  0xa5   :  { %v454_v62 = vsel %vm453_vm4, %v442_v61, %v444_v55  ;;  %v568_v63 = vsel %vm564_vm5, %v561_v58, %v563_v60 }
  0xa6   :  { %1642 = vrot.lane.b32.xlu0 %v2252_v13, %s2065_s30  ;;  %499 = vmatpush1.msra.mxu0 %v454_v62 }
  0xa7   :  { %1638 = vrot.lane.b32.xlu1 %v2257_v14, %s2065_s30  ;;  %607 = vmatprep.subr.mxu1 %v568_v63 }
  0xa8   :  { %v559_v1 = vpop.permute.xlu0 %558  ;;  %v555_v2 = vpop.permute.xlu1 %554  ;;  %1988 = vmatmul.mubr.msk.f32.vlgmr.msra.gmra.mxu0 %vm49_vm0, %v2387_v0 }
  0xa9   :  { %v567_v3 = vsel %vm564_vm5, %v559_v1, %v561_v58  ;;  %538 = vmatprep.mubr.f32.mxu0 %v2060_v6  ;;  %v2505_v1 = vld [vmem:[%s2620_s1 + $0x88] sm:$0xff] }
  0xaa   :  { %1755 = vrot.lane.b32.xlu0 %v2221_v9, %s2066_s3  ;;  %608 = vmatpush1.msra.mxu1 %v567_v3 }
  0xab   :  { %1757 = vrot.lane.b32.xlu1 %v2229_v10, %s2066_s3 }
  0xac   :  { %v557_v5 = vpop.permute.xlu0 %556  ;;  %v553_v15 = vpop.permute.xlu1 %552  ;;  %1989 = vmatmul.mubr.msk.f32.gmra.mxu0 %vm49_vm0, %v2400_v4 }
  0xad   :  { %v565_v16 = vsel %vm564_vm5, %v553_v15, %v555_v2  ;;  %v566_v17 = vsel %vm564_vm5, %v555_v2, %v557_v5  ;;  %754 = vmatprep.mubr.f32.mxu0 %v2060_v6 }
  0xae   :  { %1753 = vrot.lane.b32.xlu0 %v2238_v11, %s2066_s3  ;;  %609 = vmatprep.subr.mxu1 %v566_v17 }
  0xaf   :  { %1749 = vrot.lane.b32.xlu1 %v2243_v12, %s2066_s3  ;;  %610 = vmatpush1.msra.mxu1 %v565_v16 }
  0xb0   :  { %v672_v19 = vpop.permute.xlu0 %671  ;;  %v674_v20 = vpop.permute.xlu1 %673  ;;  %1992 = vmatmul.mubr.msk.f32.vlgmr.msra.gmra.mxu1 %vm49_vm0, %v2413_v18 }
  0xb1   :  { %v679_v21 = vsel %vm675_vm6, %v672_v19, %v674_v20  ;;  %649 = vmatprep.mubr.f32.mxu1 %v2060_v6 }
  0xb2   :  { %1751 = vrot.lane.b32.xlu0 %v2252_v13, %s2066_s3  ;;  %718 = vmatprep.subr.mxu0 %v679_v21 }
  0xb3   :  { %1864 = vrot.lane.b32.xlu1 %v2221_v9, %s2067_s4 }
  0xb4   :  { %v670_v23 = vpop.permute.xlu0 %669  ;;  %v666_v24 = vpop.permute.xlu1 %665  ;;  %1993 = vmatmul.mubr.msk.f32.gmra.mxu1 %vm49_vm0, %v2427_v22 }
  0xb5   :  { %v678_v26 = vsel %vm675_vm6, %v670_v23, %v672_v19  ;;  %865 = vmatprep.mubr.f32.mxu1 %v2060_v6 }
  0xb6   :  { %1866 = vrot.lane.b32.xlu0 %v2229_v10, %s2067_s4  ;;  %719 = vmatpush1.msra.mxu0 %v678_v26 }
  0xb7   :  { %1747 = vrot.lane.b32.xlu1 %v2257_v14, %s2066_s3 }
  0xb8   :  { %v668_v27 = vpop.permute.xlu0 %667  ;;  %v783_v28 = vpop.permute.xlu1 %782 }
  0xb9   :  { %v677_v30 = vsel %vm675_vm6, %v666_v24, %v668_v27 }
  0xba   :  { %1862 = vrot.lane.b32.xlu0 %v2238_v11, %s2067_s4  ;;  %720 = vmatprep.subr.mxu0 %v677_v30 }
  0xbb   :  { %1858 = vrot.lane.b32.xlu1 %v2243_v12, %s2067_s4 }
  0xbc   :  { %v785_v31 = vpop.permute.xlu0 %784  ;;  %v664_v32 = vpop.permute.xlu1 %663 }
  0xbd   :  { %v676_v10 = vsel %vm675_vm6, %v664_v32, %v666_v24  ;;  %v790_v33 = vsel %vm786_vm7, %v783_v28, %v785_v31 }
  0xbe   :  { %1860 = vrot.lane.b32.xlu0 %v2252_v13, %s2067_s4  ;;  %721 = vmatpush1.msra.mxu0 %v676_v10 }
  0xbf   :  { %1856 = vrot.lane.b32.xlu1 %v2257_v14, %s2067_s4  ;;  %829 = vmatprep.subr.mxu1 %v790_v33 }
  0xc0   :  { %v781_v35 = vpop.permute.xlu0 %780  ;;  %v777_v36 = vpop.permute.xlu1 %776  ;;  %1996 = vmatmul.mubr.msk.f32.vlgmr.msra.gmra.mxu0 %vm49_vm0, %v2451_v34 }
  0xc1   :  { %v789_v37 = vsel %vm786_vm7, %v781_v35, %v783_v28  ;;  %760 = vmatprep.mubr.f32.mxu0 %v2060_v6 }
  0xc2   :  { %830 = vmatpush1.msra.mxu1 %v789_v37 }
  0xc4   :  { %v779_v13 = vpop.permute.xlu0 %778  ;;  %v775_v39 = vpop.permute.xlu1 %774  ;;  %1997 = vmatmul.mubr.msk.f32.gmra.mxu0 %vm49_vm0, %v2464_v38 }
  0xc5   :  { %v787_v41 = vsel %vm786_vm7, %v775_v39, %v777_v36  ;;  %v788_v42 = vsel %vm786_vm7, %v777_v36, %v779_v13  ;;  %976 = vmatprep.mubr.f32.mxu0 %v2060_v6 }
  0xc6   :  { %831 = vmatprep.subr.mxu1 %v788_v42 }
  0xc7   :  { %832 = vmatpush1.msra.mxu1 %v787_v41 }
  0xc8   :  { %v894_v45 = vpop.permute.xlu0 %893  ;;  %v896_v46 = vpop.permute.xlu1 %895  ;;  %2000 = vmatmul.mubr.msk.f32.vlgmr.msra.gmra.mxu1 %vm49_vm0, %v2473_v43 }
  0xc9   :  { %v901_v47 = vsel %vm897_vm8, %v894_v45, %v896_v46  ;;  %871 = vmatprep.mubr.f32.mxu1 %v2060_v6 }
  0xca   :  { %940 = vmatprep.subr.mxu0 %v901_v47 }
  0xcc   :  { %v892_v50 = vpop.permute.xlu0 %891  ;;  %v888_v51 = vpop.permute.xlu1 %887  ;;  %2001 = vmatmul.mubr.msk.f32.gmra.mxu1 %vm49_vm0, %v2483_v48 }
  0xcd   :  { %v900_v52 = vsel %vm897_vm8, %v892_v50, %v894_v45  ;;  %1104 = vmatprep.mubr.f32.mxu1 %v2060_v6 }
  0xce   :  { %941 = vmatpush1.msra.mxu0 %v900_v52 }
  0xd0   :  { %v890_v54 = vpop.permute.xlu0 %889  ;;  %v1023_v55 = vpop.permute.xlu1 %1022 }
  0xd1   :  { %v899_v56 = vsel %vm897_vm8, %v888_v51, %v890_v54 }
  0xd2   :  { %942 = vmatprep.subr.mxu0 %v899_v56 }
  0xd4   :  { %v1025_v57 = vpop.permute.xlu0 %1024  ;;  %v886_v58 = vpop.permute.xlu1 %885 }
  0xd5   :  { %v898_v60 = vsel %vm897_vm8, %v886_v58, %v888_v51  ;;  %v1029_v61 = vsel %vm40_vm1, %v1023_v55, %v1025_v57 }
  0xd6   :  { %943 = vmatpush1.msra.mxu0 %v898_v60  ;;  %1068 = vmatprep.subr.mxu1 %v1029_v61 }
  0xd7   :  { %2004 = vmatmul.mubr.msk.f32.vlgmr.msra.gmra.mxu0 %vm49_vm0, %v2493_v59  ;;  %1151 = vmatprep.subr.mxu0 %v2221_v9 }
  0xd8   :  { %v1021_v62 = vpop.permute.xlu0 %1020  ;;  %v1017_v63 = vpop.permute.xlu1 %1016  ;;  %1152 = vmatpush1.msra.mxu0 %v2238_v11  ;;  %982 = vmatprep.mubr.f32.mxu0 %v2060_v6 }
  0xd9   :  { %v1028_v2 = vsel %vm40_vm1, %v1021_v62, %v1023_v55  ;;  %1153 = vmatprep.subr.mxu0 %v2243_v12 }
  0xda   :  { %1069 = vmatpush1.msra.mxu1 %v1028_v2  ;;  %1154 = vmatpush1.msra.mxu0 %v2257_v14 }
  0xdb   :  { %2005 = vmatmul.mubr.msk.f32.gmra.mxu0 %vm49_vm0, %v2505_v1 }
  0xdc   :  { %v1019_v9 = vpop.permute.xlu0 %1018  ;;  %v1015_v3 = vpop.permute.xlu1 %1014  ;;  %1187 = vmatprep.mubr.f32.mxu0 %v2060_v6 }
  0xdd   :  { %v1026_v11 = vsel %vm40_vm1, %v1015_v3, %v1017_v63  ;;  %v1027_v5 = vsel %vm40_vm1, %v1017_v63, %v1019_v9 }
  0xde   :  { %1070 = vmatprep.subr.mxu1 %v1027_v5 }
  0xdf   :  { %1071 = vmatpush1.msra.mxu1 %v1026_v11  ;;  %2016 = vmatmul.mubr.msk.f32.vlgmr.msra.gmra.mxu0 %vm49_vm0, %v2139_v7 }
  0xe0   :  { %v1211_v12 = vpop.permute.xlu0 %1210  ;;  %v1213_v15 = vpop.permute.xlu1 %1212  ;;  %2014 = vmatmul.mubr.msk.f32.vlgmr.msra.gmra.mxu1 %vm49_vm0, %v2286_v25  ;;  %1193 = vmatprep.mubr.f32.mxu0 %v2060_v6 }
  0xe1   :  { %v1217_v14 = vsel %vm231_vm2, %v1211_v12, %v1213_v15  ;;  %1110 = vmatprep.mubr.f32.mxu1 %v2060_v6 }
  0xe2   :  { %1256 = vmatprep.subr.mxu1 %v1217_v14 }
  0xe3   :  { %2017 = vmatmul.mubr.msk.f32.gmra.mxu0 %vm49_vm0, %v2165_v8 }
  0xe4   :  { %v1209_v16 = vpop.permute.xlu0 %1208  ;;  %v1205_v17 = vpop.permute.xlu1 %1204  ;;  %2015 = vmatmul.mubr.msk.f32.gmra.mxu1 %vm49_vm0, %v2299_v29  ;;  %1401 = vmatprep.mubr.f32.mxu0 %v2060_v6 }
  0xe5   :  { %v1216_v7 = vsel %vm231_vm2, %v1209_v16, %v1211_v12  ;;  %1292 = vmatprep.mubr.f32.mxu1 %v2060_v6 }
  0xe6   :  { %1257 = vmatpush1.msra.mxu1 %v1216_v7 }
  0xe8   :  { %v1207_v25 = vpop.permute.xlu0 %1206  ;;  %v1203_v19 = vpop.permute.xlu1 %1202 }
  0xe9   :  { %v1214_v20 = vsel %vm231_vm2, %v1203_v19, %v1205_v17  ;;  %v1215_v21 = vsel %vm231_vm2, %v1205_v17, %v1207_v25 }
  0xea   :  { %1258 = vmatprep.subr.mxu1 %v1215_v21 }
  0xeb   :  { %1259 = vmatpush1.msra.mxu1 %v1214_v20 }
  0xec   :  { %v1320_v8 = vpop.permute.xlu0 %1319  ;;  %2020 = vmatmul.mubr.msk.f32.vlgmr.msra.gmra.mxu1 %vm49_vm0, %v2323_v40 }
  0xed   :  { %v1322_v29 = vpop.permute.xlu1 %1321  ;;  %1298 = vmatprep.mubr.f32.mxu1 %v2060_v6 }
  0xee   :  { %v1326_v23 = vsel %vm342_vm3, %v1320_v8, %v1322_v29 }
  0xef   :  { %1365 = vmatprep.subr.mxu0 %v1326_v23  ;;  %v205_v23 = vpop.f32.mrf.mxu1 }
  0xf0   :  { %v1318_v24 = vpop.permute.xlu0 %1317  ;;  %2021 = vmatmul.mubr.msk.f32.gmra.mxu1 %vm49_vm0, %v2336_v44 }
  0xf1   :  { %v1325_v26 = vsel %vm342_vm3, %v1318_v24, %v1320_v8  ;;  %v1314_v27 = vpop.permute.xlu1 %1313  ;;  %1510 = vmatprep.mubr.f32.mxu1 %v2060_v6  ;;  %v207_v24 = vpop.f32.mrf.mxu1 }
  0xf2   :  { %1366 = vmatpush1.msra.mxu0 %v1325_v26 }
  0xf4   :  { %v1316_v28 = vpop.permute.xlu0 %1315 }
  0xf5   :  { %v1429_v30 = vpop.permute.xlu1 %1428  ;;  %v1324_v40 = vsel %vm342_vm3, %v1314_v27, %v1316_v28 }
  0xf6   :  { %1367 = vmatprep.subr.mxu0 %v1324_v40 }
  0xf8   :  { %v1431_v31 = vpop.permute.xlu0 %1430 }
  0xf9   :  { %v1312_v32 = vpop.permute.xlu1 %1311  ;;  %v1435_v10 = vsel %vm453_vm4, %v1429_v30, %v1431_v31 }
  0xfa   :  { %v1323_v33 = vsel %vm342_vm3, %v1312_v32, %v1314_v27  ;;  %1474 = vmatprep.subr.mxu1 %v1435_v10  ;;  %v211_v27 = vpop.f32.mrf.mxu1 }
  0xfb   :  { %1368 = vmatpush1.msra.mxu0 %v1323_v33 }
  0xfc   :  { %v1427_v44 = vpop.permute.xlu0 %1426  ;;  %2024 = vmatmul.mubr.msk.f32.vlgmr.msra.gmra.mxu0 %vm49_vm0, %v2349_v49 }
  0xfd   :  { %v1434_v35 = vsel %vm453_vm4, %v1427_v44, %v1429_v30  ;;  %v1423_v36 = vpop.permute.xlu1 %1422  ;;  %1407 = vmatprep.mubr.f32.mxu0 %v2060_v6  ;;  %v213_v30 = vpop.f32.mrf.mxu1 }
  0xfe   :  { %1475 = vmatpush1.msra.mxu1 %v1434_v35 }
 0x100   :  { %v1425_v37 = vpop.permute.xlu0 %1424  ;;  %2025 = vmatmul.mubr.msk.f32.gmra.mxu0 %vm49_vm0, %v2363_v53 }
 0x101   :  { %v1421_v13 = vpop.permute.xlu1 %1420  ;;  %v1433_v39 = vsel %vm453_vm4, %v1423_v36, %v1425_v37  ;;  %1619 = vmatprep.mubr.f32.mxu0 %v2060_v6 }
 0x102   :  { %v1432_v41 = vsel %vm453_vm4, %v1421_v13, %v1423_v36  ;;  %1476 = vmatprep.subr.mxu1 %v1433_v39 }
 0x103   :  { %1477 = vmatpush1.msra.mxu1 %v1432_v41 }
 0x104   :  { %v1538_v49 = vpop.permute.xlu0 %1537  ;;  %2028 = vmatmul.mubr.msk.f32.vlgmr.msra.gmra.mxu1 %vm49_vm0, %v2387_v0 }
 0x105   :  { %v1540_v42 = vpop.permute.xlu1 %1539  ;;  %1516 = vmatprep.mubr.f32.mxu1 %v2060_v6 }
 0x106   :  { %v1544_v45 = vsel %vm564_vm5, %v1538_v49, %v1540_v42 }
 0x107   :  { %1583 = vmatprep.subr.mxu0 %v1544_v45 }
 0x108   :  { %v1536_v53 = vpop.permute.xlu0 %1535  ;;  %2029 = vmatmul.mubr.msk.f32.gmra.mxu1 %vm49_vm0, %v2400_v4 }
 0x109   :  { %v1543_v46 = vsel %vm564_vm5, %v1536_v53, %v1538_v49  ;;  %v1532_v47 = vpop.permute.xlu1 %1531  ;;  %1728 = vmatprep.mubr.f32.mxu1 %v2060_v6 }
 0x10a   :  { %1584 = vmatpush1.msra.mxu0 %v1543_v46 }
 0x10c   :  { %v1534_v50 = vpop.permute.xlu0 %1533 }
 0x10d   :  { %v1647_v51 = vpop.permute.xlu1 %1646  ;;  %v1542_v0 = vsel %vm564_vm5, %v1532_v47, %v1534_v50 }
 0x10e   :  { %1585 = vmatprep.subr.mxu0 %v1542_v0 }
 0x110   :  { %v1649_v52 = vpop.permute.xlu0 %1648 }
 0x111   :  { %v1530_v54 = vpop.permute.xlu1 %1529  ;;  %v1653_v55 = vsel %vm675_vm6, %v1647_v51, %v1649_v52 }
 0x112   :  { %v1541_v56 = vsel %vm564_vm5, %v1530_v54, %v1532_v47  ;;  %1692 = vmatprep.subr.mxu1 %v1653_v55 }
 0x113   :  { %1586 = vmatpush1.msra.mxu0 %v1541_v56 }
 0x114   :  { %v1645_v4 = vpop.permute.xlu0 %1644  ;;  %2032 = vmatmul.mubr.msk.f32.vlgmr.msra.gmra.mxu0 %vm49_vm0, %v2413_v18 }
 0x115   :  { %v1652_v57 = vsel %vm675_vm6, %v1645_v4, %v1647_v51  ;;  %v1641_v58 = vpop.permute.xlu1 %1640  ;;  %1625 = vmatprep.mubr.f32.mxu0 %v2060_v6 }
 0x116   :  { %1693 = vmatpush1.msra.mxu1 %v1652_v57 }
 0x118   :  { %v1643_v60 = vpop.permute.xlu0 %1642  ;;  %2033 = vmatmul.mubr.msk.f32.gmra.mxu0 %vm49_vm0, %v2427_v22 }
 0x119   :  { %v1639_v61 = vpop.permute.xlu1 %1638  ;;  %v1651_v62 = vsel %vm675_vm6, %v1641_v58, %v1643_v60  ;;  %1837 = vmatprep.mubr.f32.mxu0 %v2060_v6 }
 0x11a   :  { %v1650_v63 = vsel %vm675_vm6, %v1639_v61, %v1641_v58  ;;  %1694 = vmatprep.subr.mxu1 %v1651_v62 }
 0x11b   :  { %1695 = vmatpush1.msra.mxu1 %v1650_v63 }
 0x11c   :  { %v1756_v18 = vpop.permute.xlu0 %1755  ;;  %2036 = vmatmul.mubr.msk.f32.vlgmr.msra.gmra.mxu1 %vm49_vm0, %v2451_v34 }
 0x11d   :  { %v1758_v2 = vpop.permute.xlu1 %1757  ;;  %1734 = vmatprep.mubr.f32.mxu1 %v2060_v6 }
 0x11e   :  { %v1762_v9 = vsel %vm786_vm7, %v1756_v18, %v1758_v2 }
 0x11f   :  { %1801 = vmatprep.subr.mxu0 %v1762_v9 }
 0x120   :  { %v1754_v22 = vpop.permute.xlu0 %1753  ;;  %2037 = vmatmul.mubr.msk.f32.gmra.mxu1 %vm49_vm0, %v2464_v38 }
 0x121   :  { %v1761_v3 = vsel %vm786_vm7, %v1754_v22, %v1756_v18  ;;  %v1750_v11 = vpop.permute.xlu1 %1749  ;;  %1946 = vmatprep.mubr.f32.mxu1 %v2060_v6 }
 0x122   :  { %1802 = vmatpush1.msra.mxu0 %v1761_v3 }
 0x124   :  { %v1752_v5 = vpop.permute.xlu0 %1751 }
 0x125   :  { %v1865_v12 = vpop.permute.xlu1 %1864  ;;  %v1760_v34 = vsel %vm786_vm7, %v1750_v11, %v1752_v5 }
 0x126   :  { %1803 = vmatprep.subr.mxu0 %v1760_v34 }
 0x128   :  { %v1867_v15 = vpop.permute.xlu0 %1866 }
 0x129   :  { %v1748_v14 = vpop.permute.xlu1 %1747  ;;  %v1871_v16 = vsel %vm897_vm8, %v1865_v12, %v1867_v15 }
 0x12a   :  { %v1759_v17 = vsel %vm786_vm7, %v1748_v14, %v1750_v11  ;;  %1910 = vmatprep.subr.mxu1 %v1871_v16 }
 0x12b   :  { %1804 = vmatpush1.msra.mxu0 %v1759_v17 }
 0x12c   :  { %2040 = vmatmul.mubr.msk.f32.vlgmr.msra.gmra.mxu0 %vm49_vm0, %v2473_v43  ;;  %v1863_v38 = vpop.permute.xlu0 %1862 }
 0x12d   :  { %v1870_v7 = vsel %vm897_vm8, %v1863_v38, %v1865_v12  ;;  %v1859_v25 = vpop.permute.xlu1 %1858  ;;  %1843 = vmatprep.mubr.f32.mxu0 %v2060_v6 }
 0x12e   :  { %1911 = vmatpush1.msra.mxu1 %v1870_v7 }
 0x130   :  { %2041 = vmatmul.mubr.msk.f32.gmra.mxu0 %vm49_vm0, %v2483_v48  ;;  %v1861_v19 = vpop.permute.xlu0 %1860 }
 0x131   :  { %v1857_v20 = vpop.permute.xlu1 %1856  ;;  %v1869_v21 = vsel %vm897_vm8, %v1859_v25, %v1861_v19 }
 0x132   :  { %v1868_v8 = vsel %vm897_vm8, %v1857_v20, %v1859_v25  ;;  %1912 = vmatprep.subr.mxu1 %v1869_v21 }
 0x133   :  { %1913 = vmatpush1.msra.mxu1 %v1868_v8 }
 0x134   :  { %2044 = vmatmul.mubr.msk.f32.vlgmr.msra.gmra.mxu1 %vm49_vm0, %v2493_v59 }
 0x135   :  { %1952 = vmatprep.mubr.f32.mxu1 %v2060_v6 }
 0x138   :  { %2045 = vmatmul.mubr.msk.f32.gmra.mxu1 %vm49_vm0, %v2505_v1 }
 0x140   :  { %v122_v43 = vpop.f32.mrf.mxu0 }
 0x141   :  { %v206_v1 = vadd.f32 %v205_v23, %v122_v43 }
 0x142   :  { %v124_v29 = vpop.f32.mrf.mxu0 }
 0x143   :  { %v208_v37 = vadd.f32 %v207_v24, %v124_v29 }
 0x144   :  { %v128_v48 = vpop.f32.mrf.mxu0 }
 0x145   :  { %v212_v49 = vadd.f32 %v211_v27, %v128_v48 }
 0x146   :  { %v130_v26 = vpop.f32.mrf.mxu0 }
 0x147   :  { %v214_v45 = vadd.f32 %v213_v30, %v130_v26 }
 0x150   :  { %v312_v28 = vpop.f32.mrf.mxu0 }
 0x151   :  { %v323_v41 = vadd.f32 %v312_v28, %v206_v1 }
 0x152   :  { %v314_v40 = vpop.f32.mrf.mxu0 }
 0x153   :  { %v324_v42 = vadd.f32 %v314_v40, %v208_v37 }
 0x154   :  { %v318_v32 = vpop.f32.mrf.mxu0 }
 0x155   :  { %v325_v47 = vadd.f32 %v318_v32, %v212_v49 }
 0x156   :  { %v320_v33 = vpop.f32.mrf.mxu0 }
 0x157   :  { %v326_v51 = vadd.f32 %v320_v33, %v214_v45 }
 0x158   :  { %v423_v31 = vpop.f32.mrf.mxu1 }
 0x159   :  { %v434_v50 = vadd.f32 %v423_v31, %v323_v41 }
 0x15a   :  { %v425_v10 = vpop.f32.mrf.mxu1 }
 0x15b   :  { %v435_v0 = vadd.f32 %v425_v10, %v324_v42 }
 0x15c   :  { %v429_v59 = vpop.f32.mrf.mxu1 }
 0x15d   :  { %v436_v56 = vadd.f32 %v429_v59, %v325_v47 }
 0x15e   :  { %v431_v6 = vpop.f32.mrf.mxu1 }
 0x15f   :  { %v437_v57 = vadd.f32 %v431_v6, %v326_v51 }
 0x168   :  { %v534_v44 = vpop.f32.mrf.mxu0 }
 0x169   :  { %v545_v55 = vadd.f32 %v534_v44, %v434_v50 }
 0x16a   :  { %v536_v35 = vpop.f32.mrf.mxu0 }
 0x16b   :  { %v546_v4 = vadd.f32 %v536_v35, %v435_v0 }
 0x16c   :  { %v540_v13 = vpop.f32.mrf.mxu0 }
 0x16d   :  { %v547_v61 = vadd.f32 %v540_v13, %v436_v56 }
 0x16e   :  { %v542_v53 = vpop.f32.mrf.mxu0 }
 0x16f   :  { %v548_v63 = vadd.f32 %v542_v53, %v437_v57 }
 0x170   :  { %v645_v36 = vpop.f32.mrf.mxu1 }
 0x171   :  { %v656_v62 = vadd.f32 %v645_v36, %v545_v55 }
 0x172   :  { %v647_v39 = vpop.f32.mrf.mxu1 }
 0x173   :  { %v657_v18 = vadd.f32 %v647_v39, %v546_v4 }
 0x174   :  { %v651_v46 = vpop.f32.mrf.mxu1 }
 0x175   :  { %v658_v3 = vadd.f32 %v651_v46, %v547_v61 }
 0x176   :  { %v653_v54 = vpop.f32.mrf.mxu1 }
 0x177   :  { %v659_v5 = vadd.f32 %v653_v54, %v548_v63 }
 0x180   :  { %v756_v52 = vpop.f32.mrf.mxu0 }
 0x181   :  { %v767_v22 = vadd.f32 %v756_v52, %v656_v62 }
 0x182   :  { %v758_v58 = vpop.f32.mrf.mxu0 }
 0x183   :  { %v768_v11 = vadd.f32 %v758_v58, %v657_v18 }
 0x184   :  { %v762_v2 = vpop.f32.mrf.mxu0 }
 0x185   :  { %v769_v15 = vadd.f32 %v762_v2, %v658_v3 }
 0x186   :  { %v764_v12 = vpop.f32.mrf.mxu0 }
 0x187   :  { %v770_v16 = vadd.f32 %v764_v12, %v659_v5 }
 0x188   :  { %v867_v60 = vpop.f32.mrf.mxu1 }
 0x189   :  { %v878_v14 = vadd.f32 %v867_v60, %v767_v22 }
 0x18a   :  { %v869_v9 = vpop.f32.mrf.mxu1 }
 0x18b   :  { %v879_v17 = vadd.f32 %v869_v9, %v768_v11 }
 0x18c   :  { %v873_v34 = vpop.f32.mrf.mxu1 }
 0x18d   :  { %v880_v19 = vadd.f32 %v873_v34, %v769_v15 }
 0x18e   :  { %v875_v7 = vpop.f32.mrf.mxu1 }
 0x18f   :  { %v881_v8 = vadd.f32 %v875_v7, %v770_v16 }
 0x197   :  { %v978_v38 = vpop.f32.mrf.mxu0 }
 0x198   :  { %v989_v25 = vadd.f32 %v978_v38, %v878_v14 }
 0x199   :  { %v980_v20 = vpop.f32.mrf.mxu0 }
 0x19a   :  { %993 = vst [vmem:[%s2621_s2] sm:$0xff] %v989_v25  ;;  %v990_v21 = vadd.f32 %v980_v20, %v879_v17 }
 0x19b   :  { %v984_v43 = vpop.f32.mrf.mxu0 }
 0x19c   :  { %994 = vst [vmem:[%s2621_s2 + $0x8] sm:$0xff] %v990_v21  ;;  %v991_v29 = vadd.f32 %v984_v43, %v880_v19 }
 0x19d   :  { %v986_v23 = vpop.f32.mrf.mxu0 }
 0x19e   :  { %995 = vst [vmem:[%s2621_s2 + $0x10] sm:$0xff] %v991_v29  ;;  %v992_v48 = vadd.f32 %v986_v23, %v881_v8 }
 0x19f   :  { %v1189_v28 = vpop.f32.mrf.mxu0 }
 0x1a0   :  { %996 = vst [vmem:[%s2621_s2 + $0x18] sm:$0xff] %v992_v48  ;;  %v1106_v24 = vpop.f32.mrf.mxu1 }
 0x1a1   :  { %v1191_v40 = vpop.f32.mrf.mxu0  ;;  %v1190_v39 = vadd.f32 %v1189_v28, %v1106_v24 }
 0x1a2   :  { %v1108_v26 = vpop.f32.mrf.mxu1 }
 0x1a3   :  { %v1195_v32 = vpop.f32.mrf.mxu0  ;;  %v1192_v42 = vadd.f32 %v1191_v40, %v1108_v26 }
 0x1a4   :  { %v1112_v27 = vpop.f32.mrf.mxu1 }
 0x1a5   :  { %v1197_v33 = vpop.f32.mrf.mxu0  ;;  %v1196_v53 = vadd.f32 %v1195_v32, %v1112_v27 }
 0x1a6   :  { %v1114_v30 = vpop.f32.mrf.mxu1 }
 0x1a7   :  { %v1198_v51 = vadd.f32 %v1197_v33, %v1114_v30 }
 0x1ac   :  { %v1294_v31 = vpop.f32.mrf.mxu1 }
 0x1ad   :  { %v1305_v45 = vadd.f32 %v1294_v31, %v1190_v39 }
 0x1ae   :  { %v1296_v10 = vpop.f32.mrf.mxu1 }
 0x1af   :  { %v1306_v50 = vadd.f32 %v1296_v10, %v1192_v42 }
 0x1b0   :  { %v1300_v59 = vpop.f32.mrf.mxu1 }
 0x1b1   :  { %v1307_v0 = vadd.f32 %v1300_v59, %v1196_v53 }
 0x1b2   :  { %v1302_v6 = vpop.f32.mrf.mxu1 }
 0x1b3   :  { %v1308_v56 = vadd.f32 %v1302_v6, %v1198_v51 }
 0x1bc   :  { %v1403_v44 = vpop.f32.mrf.mxu0 }
 0x1bd   :  { %v1414_v52 = vadd.f32 %v1403_v44, %v1305_v45 }
 0x1be   :  { %v1405_v35 = vpop.f32.mrf.mxu0 }
 0x1bf   :  { %v1415_v4 = vadd.f32 %v1405_v35, %v1306_v50 }
 0x1c0   :  { %v1409_v1 = vpop.f32.mrf.mxu0 }
 0x1c1   :  { %v1416_v58 = vadd.f32 %v1409_v1, %v1307_v0 }
 0x1c2   :  { %v1411_v13 = vpop.f32.mrf.mxu0 }
 0x1c3   :  { %v1417_v63 = vadd.f32 %v1411_v13, %v1308_v56 }
 0x1c4   :  { %v1512_v36 = vpop.f32.mrf.mxu1 }
 0x1c5   :  { %v1523_v57 = vadd.f32 %v1512_v36, %v1414_v52 }
 0x1c6   :  { %v1514_v37 = vpop.f32.mrf.mxu1 }
 0x1c7   :  { %v1524_v62 = vadd.f32 %v1514_v37, %v1415_v4 }
 0x1c8   :  { %v1518_v41 = vpop.f32.mrf.mxu1 }
 0x1c9   :  { %v1525_v2 = vadd.f32 %v1518_v41, %v1416_v58 }
 0x1ca   :  { %v1520_v46 = vpop.f32.mrf.mxu1 }
 0x1cb   :  { %v1526_v11 = vadd.f32 %v1520_v46, %v1417_v63 }
 0x1d4   :  { %v1621_v49 = vpop.f32.mrf.mxu0 }
 0x1d5   :  { %v1632_v9 = vadd.f32 %v1621_v49, %v1523_v57 }
 0x1d6   :  { %v1623_v47 = vpop.f32.mrf.mxu0 }
 0x1d7   :  { %v1633_v5 = vadd.f32 %v1623_v47, %v1524_v62 }
 0x1d8   :  { %v1627_v55 = vpop.f32.mrf.mxu0 }
 0x1d9   :  { %v1634_v34 = vadd.f32 %v1627_v55, %v1525_v2 }
 0x1da   :  { %v1629_v61 = vpop.f32.mrf.mxu0 }
 0x1db   :  { %v1635_v17 = vadd.f32 %v1629_v61, %v1526_v11 }
 0x1dc   :  { %v1730_v54 = vpop.f32.mrf.mxu1 }
 0x1dd   :  { %v1741_v12 = vadd.f32 %v1730_v54, %v1632_v9 }
 0x1de   :  { %v1732_v60 = vpop.f32.mrf.mxu1 }
 0x1df   :  { %v1742_v16 = vadd.f32 %v1732_v60, %v1633_v5 }
 0x1e0   :  { %v1736_v22 = vpop.f32.mrf.mxu1 }
 0x1e1   :  { %v1743_v25 = vadd.f32 %v1736_v22, %v1634_v34 }
 0x1e2   :  { %v1738_v15 = vpop.f32.mrf.mxu1 }
 0x1e3   :  { %v1744_v43 = vadd.f32 %v1738_v15, %v1635_v17 }
 0x1ec   :  { %v1839_v18 = vpop.f32.mrf.mxu0 }
 0x1ed   :  { %v1850_v38 = vadd.f32 %v1839_v18, %v1741_v12 }
 0x1ee   :  { %v1841_v3 = vpop.f32.mrf.mxu0 }
 0x1ef   :  { %v1851_v19 = vadd.f32 %v1841_v3, %v1742_v16 }
 0x1f0   :  { %v1845_v14 = vpop.f32.mrf.mxu0 }
 0x1f1   :  { %v1852_v29 = vadd.f32 %v1845_v14, %v1743_v25 }
 0x1f2   :  { %v1847_v21 = vpop.f32.mrf.mxu0 }
 0x1f3   :  { %v1853_v24 = vadd.f32 %v1847_v21, %v1744_v43 }
 0x1f4   :  { %v1948_v7 = vpop.f32.mrf.mxu1 }
 0x1f5   :  { %v1959_v20 = vadd.f32 %v1948_v7, %v1850_v38 }
 0x1f6   :  { %v1950_v8 = vpop.f32.mrf.mxu1 }
 0x1f7   :  { %2046 = vst [vmem:[%s2621_s2 + $0x20] sm:$0xff] %v1959_v20  ;;  %v1960_v23 = vadd.f32 %v1950_v8, %v1851_v19 }
 0x1f8   :  { %v1954_v48 = vpop.f32.mrf.mxu1 }
 0x1f9   :  { %2047 = vst [vmem:[%s2621_s2 + $0x28] sm:$0xff] %v1960_v23  ;;  %v1961_v26 = vadd.f32 %v1954_v48, %v1852_v29 }
 0x1fa   :  { %v1956_v27 = vpop.f32.mrf.mxu1 }
 0x1fb   :  { %2048 = vst [vmem:[%s2621_s2 + $0x30] sm:$0xff] %v1961_v26  ;;  %v1962_v28 = vadd.f32 %v1956_v27, %v1853_v24 }
 0x1fd   :  { %2049 = vst [vmem:[%s2621_s2 + $0x38] sm:$0xff] %v1962_v28 }

</bundles_post_ra>
